<compile_context>
chip_gen: v5e
topology: v5e:2x2
jax: 0.10.0
libtpu: 0.0.40
codegen_flags: <defaults>
</compile_context>

<pallas_src>
import functools
import math

import jax
import jax.numpy as jnp
from jax.experimental import pallas as pl
from jax.experimental.pallas import tpu as pltpu

BN_EPS = 1e-5
# Conservative VMEM budget: fits v7x (64 MiB physical / 32 MiB default scoped)
# as well as v5e/v6e.  Per-tile working sets are asserted against it.
VMEM_LIMIT_BYTES = 32 * 1024 * 1024


def _fits_vmem(*block_shapes):
    # double-buffered f32 blocks must fit the scoped-VMEM budget
    need = 2 * sum(4 * math.prod(s) for s in block_shapes)
    assert need <= VMEM_LIMIT_BYTES, (
        f"per-step VMEM working set {need} B exceeds budget {VMEM_LIMIT_BYTES} B"
    )


# ---------------------------------------------------------------------------
# Pass 1: both 1x1 projections (MXU matmuls over channels) + bias, plus
#         per-tile partial BatchNorm statistics (sum, sum of squares).
# ---------------------------------------------------------------------------
def _proj_stats_kernel(g_ref, x_ref, wg_ref, bg_ref, wx_ref, bx_ref,
                       yg_ref, yx_ref, st_ref, *, tile_p, p_valid):
    # (F_int, C) @ (C, TILE_P) -> (F_int, TILE_P): pixels stay on the lane axis
    yg = jnp.dot(wg_ref[...], g_ref[...],
                 preferred_element_type=jnp.float32) + bg_ref[...]
    yx = jnp.dot(wx_ref[...], x_ref[...],
                 preferred_element_type=jnp.float32) + bx_ref[...]
    yg_ref[...] = yg
    yx_ref[...] = yx

    # Mask out padded pixel columns so the batch statistics stay exact.
    if p_valid % tile_p != 0:
        col = (pl.program_id(0) * tile_p
               + jax.lax.broadcasted_iota(jnp.int32, (1, tile_p), 1))
        m = (col < p_valid).astype(jnp.float32)
        yg_m, yx_m = yg * m, yx * m
    else:
        yg_m, yx_m = yg, yx

    st = jnp.concatenate(
        [jnp.sum(yg_m, axis=1, keepdims=True),        # sum_g
         jnp.sum(yg_m * yg, axis=1, keepdims=True),   # sumsq_g
         jnp.sum(yx_m, axis=1, keepdims=True),        # sum_x
         jnp.sum(yx_m * yx, axis=1, keepdims=True)],  # sumsq_x
        axis=1)                                       # (F_int, 4)
    st_ref[...] = st[None, :, :]


# ---------------------------------------------------------------------------
# Pass 2: apply BN affine (precomputed scale/shift), add, ReLU, then the
#         1-channel psi projection as a sublane reduction (VPU/XLU — no
#         wasteful M=1 MXU matmul).
# ---------------------------------------------------------------------------
def _gate_psi_kernel(yg_ref, yx_ref, sg_ref, tg_ref, sx_ref, tx_ref,
                     wpsi_ref, bpsi_ref, psi_ref):
    h = (yg_ref[...] * sg_ref[...] + tg_ref[...]
         + yx_ref[...] * sx_ref[...] + tx_ref[...])
    h = jnp.maximum(h, 0.0)                                   # (F_int, TILE_P)
    psi_ref[...] = (jnp.sum(h * wpsi_ref[...], axis=0, keepdims=True)
                    + bpsi_ref[...])                          # (1, TILE_P)


# ---------------------------------------------------------------------------
# Pass 3: out = x * sigmoid(BN(psi_pre))  (psi broadcast over channels)
# ---------------------------------------------------------------------------
def _gate_apply_kernel(x_ref, psi_ref, s3_ref, t3_ref, o_ref):
    gate = jax.nn.sigmoid(psi_ref[...] * s3_ref[...] + t3_ref[...])  # (1, TILE_P)
    o_ref[...] = x_ref[...] * gate                                   # (F_l, TILE_P)


# ---------------------------------------------------------------------------
# Forward
# ---------------------------------------------------------------------------
def attention_block_forward(g, x, params, *, tile_p=512):
    n, fg, h, w = g.shape
    _, fl, _, _ = x.shape
    fint = params["wg"].shape[0]
    p = n * h * w

    tile_p = max(128, (tile_p // 128) * 128)          # lane-aligned tile
    p_pad = -(-p // tile_p) * tile_p
    num_tiles = p_pad // tile_p

    # NCHW -> (C, P): channels on sublanes, pixels on the 128-lane axis.
    g_cp = jnp.transpose(g.reshape(n, fg, h * w), (1, 0, 2)).reshape(fg, p)
    x_cp = jnp.transpose(x.reshape(n, fl, h * w), (1, 0, 2)).reshape(fl, p)
    if p_pad != p:
        g_cp = jnp.pad(g_cp, ((0, 0), (0, p_pad - p)))
        x_cp = jnp.pad(x_cp, ((0, 0), (0, p_pad - p)))

    wg = params["wg"]
    bg = params["bg"].reshape(fint, 1)
    wx = params["wx"]
    bx = params["bx"].reshape(fint, 1)
    wpsi_col = params["wpsi"].reshape(fint, 1)
    bpsi = params["bpsi"].reshape(1, 1)

    cparams = pltpu.CompilerParams(
        dimension_semantics=("parallel",),            # v7x: split tiles over 2 TCs
        vmem_limit_bytes=VMEM_LIMIT_BYTES)

    # ---------------- pass 1: projections + partial BN stats ----------------
    _fits_vmem((fg, tile_p), (fl, tile_p), (fint, tile_p), (fint, tile_p),
               (fint, fg), (fint, fl), (fint, 4))
    yg, yx, part = pl.pallas_call(
        functools.partial(_proj_stats_kernel, tile_p=tile_p, p_valid=p),
        out_shape=(jax.ShapeDtypeStruct((fint, p_pad), jnp.float32),
                   jax.ShapeDtypeStruct((fint, p_pad), jnp.float32),
                   jax.ShapeDtypeStruct((num_tiles, fint, 4), jnp.float32)),
        grid=(num_tiles,),
        in_specs=[
            pl.BlockSpec((fg, tile_p), lambda i: (0, i)),
            pl.BlockSpec((fl, tile_p), lambda i: (0, i)),
            pl.BlockSpec((fint, fg), lambda i: (0, 0)),   # weights hoisted
            pl.BlockSpec((fint, 1), lambda i: (0, 0)),
            pl.BlockSpec((fint, fl), lambda i: (0, 0)),
            pl.BlockSpec((fint, 1), lambda i: (0, 0)),
        ],
        out_specs=(
            pl.BlockSpec((fint, tile_p), lambda i: (0, i)),
            pl.BlockSpec((fint, tile_p), lambda i: (0, i)),
            pl.BlockSpec((1, fint, 4), lambda i: (i, 0, 0)),
        ),
        compiler_params=cparams,
    )(g_cp, x_cp, wg, bg, wx, bx)

    # Finalize BN1/BN2 (tiny O(C) math; biased variance == torch training mode).
    tot = jnp.sum(part, axis=0)                       # (F_int, 4)
    inv_p = 1.0 / p
    mean_g = tot[:, 0] * inv_p
    var_g = tot[:, 1] * inv_p - mean_g * mean_g
    mean_x = tot[:, 2] * inv_p
    var_x = tot[:, 3] * inv_p - mean_x * mean_x
    sg = params["gamma_g"] * jax.lax.rsqrt(var_g + BN_EPS)
    tg = params["beta_g"] - mean_g * sg
    sx = params["gamma_x"] * jax.lax.rsqrt(var_x + BN_EPS)
    tx = params["beta_x"] - mean_x * sx

    # ---------------- pass 2: relu(BN(yg)+BN(yx)) -> psi projection ---------
    _fits_vmem((fint, tile_p), (fint, tile_p), (1, tile_p),
               (fint, 1), (fint, 1), (fint, 1), (fint, 1), (fint, 1))
    psi = pl.pallas_call(
        _gate_psi_kernel,
        out_shape=jax.ShapeDtypeStruct((1, p_pad), jnp.float32),
        grid=(num_tiles,),
        in_specs=[
            pl.BlockSpec((fint, tile_p), lambda i: (0, i)),
            pl.BlockSpec((fint, tile_p), lambda i: (0, i)),
            pl.BlockSpec((fint, 1), lambda i: (0, 0)),
            pl.BlockSpec((fint, 1), lambda i: (0, 0)),
            pl.BlockSpec((fint, 1), lambda i: (0, 0)),
            pl.BlockSpec((fint, 1), lambda i: (0, 0)),
            pl.BlockSpec((fint, 1), lambda i: (0, 0)),
            pl.BlockSpec((1, 1), lambda i: (0, 0)),
        ],
        out_specs=pl.BlockSpec((1, tile_p), lambda i: (0, i)),
        compiler_params=cparams,
    )(yg, yx, sg.reshape(fint, 1), tg.reshape(fint, 1),
      sx.reshape(fint, 1), tx.reshape(fint, 1), wpsi_col, bpsi)

    # BN3 statistics (single channel, negligible data) done in plain JAX.
    psi_valid = psi[:, :p]
    m3 = jnp.sum(psi_valid) * inv_p
    v3 = jnp.sum(psi_valid * psi_valid) * inv_p - m3 * m3
    s3 = params["gamma_psi"] * jax.lax.rsqrt(v3 + BN_EPS)
    t3 = params["beta_psi"] - m3 * s3

    # ---------------- pass 3: out = x * sigmoid(BN(psi)) --------------------
    _fits_vmem((fl, tile_p), (1, tile_p), (fl, tile_p))
    out_cp = pl.pallas_call(
        _gate_apply_kernel,
        out_shape=jax.ShapeDtypeStruct((fl, p_pad), jnp.float32),
        grid=(num_tiles,),
        in_specs=[
            pl.BlockSpec((fl, tile_p), lambda i: (0, i)),
            pl.BlockSpec((1, tile_p), lambda i: (0, i)),
            pl.BlockSpec((1, 1), lambda i: (0, 0)),
            pl.BlockSpec((1, 1), lambda i: (0, 0)),
        ],
        out_specs=pl.BlockSpec((fl, tile_p), lambda i: (0, i)),
        compiler_params=cparams,
    )(x_cp, psi, s3.reshape(1, 1), t3.reshape(1, 1))

    out = out_cp[:, :p].reshape(fl, n, h, w)
    return jnp.transpose(out, (1, 0, 2, 3))           # (C,N,H,W) -> NCHW


# ---------------------------------------------------------------------------
# Deterministic parameter init (same fan-in bounds as torch Conv2d 1x1)
# ---------------------------------------------------------------------------
def init_params(key, f_g, f_l, f_int):
    k = jax.random.split(key, 6)
    bgd = 1.0 / math.sqrt(f_g)
    bxd = 1.0 / math.sqrt(f_l)
    bpd = 1.0 / math.sqrt(f_int)
    return {
        "wg": jax.random.uniform(k[0], (f_int, f_g), jnp.float32, -bgd, bgd),
        "bg": jax.random.uniform(k[1], (f_int,), jnp.float32, -bgd, bgd),
        "gamma_g": jnp.ones((f_int,), jnp.float32),
        "beta_g": jnp.zeros((f_int,), jnp.float32),
        "wx": jax.random.uniform(k[2], (f_int, f_l), jnp.float32, -bxd, bxd),
        "bx": jax.random.uniform(k[3], (f_int,), jnp.float32, -bxd, bxd),
        "gamma_x": jnp.ones((f_int,), jnp.float32),
        "beta_x": jnp.zeros((f_int,), jnp.float32),
        "wpsi": jax.random.uniform(k[4], (1, f_int), jnp.float32, -bpd, bpd),
        "bpsi": jax.random.uniform(k[5], (1,), jnp.float32, -bpd, bpd),
        "gamma_psi": jnp.ones((1,), jnp.float32),
        "beta_psi": jnp.zeros((1,), jnp.float32),
    }


# ---------------------------------------------------------------------------
# Pure-JAX reference (matches the torch module in training mode)
# ---------------------------------------------------------------------------
def _reference(g, x, params):
    def conv1x1(z, wmat, b):
        return jnp.einsum("nchw,oc->nohw", z, wmat) + b[None, :, None, None]

    def bn_train(z, gamma, beta):
        mu = jnp.mean(z, axis=(0, 2, 3), keepdims=True)
        var = jnp.mean((z - mu) ** 2, axis=(0, 2, 3), keepdims=True)
        zn = (z - mu) * jax.lax.rsqrt(var + BN_EPS)
        return zn * gamma[None, :, None, None] + beta[None, :, None, None]

    g1 = bn_train(conv1x1(g, params["wg"], params["bg"]),
                  params["gamma_g"], params["beta_g"])
    x1 = bn_train(conv1x1(x, params["wx"], params["bx"]),
                  params["gamma_x"], params["beta_x"])
    hid = jnp.maximum(g1 + x1, 0.0)
    psi = bn_train(conv1x1(hid, params["wpsi"], params["bpsi"]),
                   params["gamma_psi"], params["beta_psi"])
    return x * jax.nn.sigmoid(psi)


if __name__ == "__main__":
    key = jax.random.PRNGKey(0)
    kg, kx, kp = jax.random.split(key, 3)

    # F_g = F_l = 32, F_int = 16, batch=2, spatial=16x16  ->  P = 512
    N, F_G, F_L, F_INT, H, W = 2, 32, 32, 16, 16, 16
    g = jax.random.normal(kg, (N, F_G, H, W), jnp.float32)
    x = jax.random.normal(kx, (N, F_L, H, W), jnp.float32)
    params = init_params(kp, F_G, F_L, F_INT)

    # tile_p=128 -> 4 pixel tiles so the grid / pipelining actually exercises.
    fwd = jax.jit(functools.partial(attention_block_forward, tile_p=128))
    out = jax.block_until_ready(fwd(g, x, params))
    assert out.shape == (N, F_L, H, W), out.shape

    ref = _reference(g, x, params)
    err = float(jnp.max(jnp.abs(out - ref)))
    assert err < 2e-3, f"mismatch vs reference: {err}"
    print("KERNEL_OK")
</pallas_src>

<mosaic_0001>
module attributes {stable_mosaic.version = 11 : i64} {
  func.func @_proj_stats_kernel(%arg0: i32, %arg1: memref<32x128xf32, #tpu.memory_space<vmem>>, %arg2: memref<32x128xf32, #tpu.memory_space<vmem>>, %arg3: memref<16x32xf32, #tpu.memory_space<vmem>>, %arg4: memref<16x1xf32, #tpu.memory_space<vmem>>, %arg5: memref<16x32xf32, #tpu.memory_space<vmem>>, %arg6: memref<16x1xf32, #tpu.memory_space<vmem>>, %arg7: memref<16x128xf32, #tpu.memory_space<vmem>>, %arg8: memref<16x128xf32, #tpu.memory_space<vmem>>, %arg9: memref<1x16x4xf32, #tpu.memory_space<vmem>>) attributes {dimension_semantics = [#tpu.dimension_semantics<parallel>], iteration_bounds = array<i64: 4>, scalar_prefetch = 0 : i64, scratch_operands = 0 : i64, tpu.core_type = #tpu.core_type<tc>, window_params = [{transform_indices = @transform_0, window_bounds = array<i64: 32, 128>}, {transform_indices = @transform_1, window_bounds = array<i64: 32, 128>}, {pipeline_mode = #tpu.pipeline_mode<synchronous>, transform_indices = @transform_2, window_bounds = array<i64: 16, 32>}, {pipeline_mode = #tpu.pipeline_mode<synchronous>, transform_indices = @transform_3, window_bounds = array<i64: 16, 1>}, {pipeline_mode = #tpu.pipeline_mode<synchronous>, transform_indices = @transform_4, window_bounds = array<i64: 16, 32>}, {pipeline_mode = #tpu.pipeline_mode<synchronous>, transform_indices = @transform_5, window_bounds = array<i64: 16, 1>}, {transform_indices = @transform_6, window_bounds = array<i64: 16, 128>}, {transform_indices = @transform_7, window_bounds = array<i64: 16, 128>}, {transform_indices = @transform_8, window_bounds = array<i64: 1, 16, 4>}]} {
    %c0 = arith.constant 0 : index
    %c0_0 = arith.constant 0 : index
    %0 = vector.load %arg3[%c0, %c0_0] : memref<16x32xf32, #tpu.memory_space<vmem>>, vector<16x32xf32>
    %c0_1 = arith.constant 0 : index
    %c0_2 = arith.constant 0 : index
    %1 = vector.load %arg1[%c0_1, %c0_2] : memref<32x128xf32, #tpu.memory_space<vmem>>, vector<32x128xf32>
    %cst = arith.constant dense<0.000000e+00> : vector<16x128xf32>
    %2 = tpu.matmul %0, %1, %cst {dimension_numbers = #tpu.dot_dimension_numbers<[1], [0], [0], [1], [0, 0, 1, 1], [], []>} : vector<16x32xf32>, vector<32x128xf32>, vector<16x128xf32> -> vector<16x128xf32>
    %c0_3 = arith.constant 0 : index
    %c0_4 = arith.constant 0 : index
    %3 = vector.load %arg4[%c0_3, %c0_4] : memref<16x1xf32, #tpu.memory_space<vmem>>, vector<16x1xf32>
    %4 = vector.broadcast %3 : vector<16x1xf32> to vector<16x128xf32>
    %5 = arith.addf %2, %4 : vector<16x128xf32>
    %c0_5 = arith.constant 0 : index
    %c0_6 = arith.constant 0 : index
    %6 = vector.load %arg5[%c0_5, %c0_6] : memref<16x32xf32, #tpu.memory_space<vmem>>, vector<16x32xf32>
    %c0_7 = arith.constant 0 : index
    %c0_8 = arith.constant 0 : index
    %7 = vector.load %arg2[%c0_7, %c0_8] : memref<32x128xf32, #tpu.memory_space<vmem>>, vector<32x128xf32>
    %cst_9 = arith.constant dense<0.000000e+00> : vector<16x128xf32>
    %8 = tpu.matmul %6, %7, %cst_9 {dimension_numbers = #tpu.dot_dimension_numbers<[1], [0], [0], [1], [0, 0, 1, 1], [], []>} : vector<16x32xf32>, vector<32x128xf32>, vector<16x128xf32> -> vector<16x128xf32>
    %c0_10 = arith.constant 0 : index
    %c0_11 = arith.constant 0 : index
    %9 = vector.load %arg6[%c0_10, %c0_11] : memref<16x1xf32, #tpu.memory_space<vmem>>, vector<16x1xf32>
    %10 = vector.broadcast %9 : vector<16x1xf32> to vector<16x128xf32>
    %11 = arith.addf %8, %10 : vector<16x128xf32>
    %c0_12 = arith.constant 0 : index
    %c0_13 = arith.constant 0 : index
    %12 = vector.load %arg7[%c0_12, %c0_13] : memref<16x128xf32, #tpu.memory_space<vmem>>, vector<16x128xf32>
    tpu.vector_store %arg7[%c0_12, %c0_13], %5 {strides = array<i32>} : memref<16x128xf32, #tpu.memory_space<vmem>>, vector<16x128xf32>,
    %c0_14 = arith.constant 0 : index
    %c0_15 = arith.constant 0 : index
    %13 = vector.load %arg8[%c0_14, %c0_15] : memref<16x128xf32, #tpu.memory_space<vmem>>, vector<16x128xf32>
    tpu.vector_store %arg8[%c0_14, %c0_15], %11 {strides = array<i32>} : memref<16x128xf32, #tpu.memory_space<vmem>>, vector<16x128xf32>,
    %cst_16 = arith.constant dense<0.000000e+00> : vector<16xf32>
    %14 = vector.multi_reduction <add>, %5, %cst_16 [1] : vector<16x128xf32> to vector<16xf32>
    %15 = vector.shape_cast %14 : vector<16xf32> to vector<16x1xf32>
    %16 = arith.mulf %5, %5 : vector<16x128xf32>
    %cst_17 = arith.constant dense<0.000000e+00> : vector<16xf32>
    %17 = vector.multi_reduction <add>, %16, %cst_17 [1] : vector<16x128xf32> to vector<16xf32>
    %18 = vector.shape_cast %17 : vector<16xf32> to vector<16x1xf32>
    %cst_18 = arith.constant dense<0.000000e+00> : vector<16xf32>
    %19 = vector.multi_reduction <add>, %11, %cst_18 [1] : vector<16x128xf32> to vector<16xf32>
    %20 = vector.shape_cast %19 : vector<16xf32> to vector<16x1xf32>
    %21 = arith.mulf %11, %11 : vector<16x128xf32>
    %cst_19 = arith.constant dense<0.000000e+00> : vector<16xf32>
    %22 = vector.multi_reduction <add>, %21, %cst_19 [1] : vector<16x128xf32> to vector<16xf32>
    %23 = vector.shape_cast %22 : vector<16xf32> to vector<16x1xf32>
    %24 = tpu.concatenate %15, %18, %20, %23 in 1 : vector<16x1xf32>, vector<16x1xf32>, vector<16x1xf32>, vector<16x1xf32> -> vector<16x4xf32>
    %25 = vector.shape_cast %24 : vector<16x4xf32> to vector<1x16x4xf32>
    %c0_20 = arith.constant 0 : index
    %c0_21 = arith.constant 0 : index
    %c0_22 = arith.constant 0 : index
    %26 = vector.load %arg9[%c0_20, %c0_21, %c0_22] : memref<1x16x4xf32, #tpu.memory_space<vmem>>, vector<1x16x4xf32>
    tpu.vector_store %arg9[%c0_20, %c0_21, %c0_22], %25 {strides = array<i32>} : memref<1x16x4xf32, #tpu.memory_space<vmem>>, vector<1x16x4xf32>,
    return
  }
  func.func @transform_0(%arg0: i32) -> (i32, i32) {
    %c0_i32 = arith.constant 0 : i32
    %c0_i32_0 = arith.constant 0 : i32
    return %c0_i32, %arg0 : i32, i32
  }
  func.func @transform_1(%arg0: i32) -> (i32, i32) {
    %c0_i32 = arith.constant 0 : i32
    %c0_i32_0 = arith.constant 0 : i32
    return %c0_i32, %arg0 : i32, i32
  }
  func.func @transform_2(%arg0: i32) -> (i32, i32) {
    %c0_i32 = arith.constant 0 : i32
    %c0_i32_0 = arith.constant 0 : i32
    %c0_i32_1 = arith.constant 0 : i32
    return %c0_i32, %c0_i32_0 : i32, i32
  }
  func.func @transform_3(%arg0: i32) -> (i32, i32) {
    %c0_i32 = arith.constant 0 : i32
    %c0_i32_0 = arith.constant 0 : i32
    %c0_i32_1 = arith.constant 0 : i32
    return %c0_i32, %c0_i32_0 : i32, i32
  }
  func.func @transform_4(%arg0: i32) -> (i32, i32) {
    %c0_i32 = arith.constant 0 : i32
    %c0_i32_0 = arith.constant 0 : i32
    %c0_i32_1 = arith.constant 0 : i32
    return %c0_i32, %c0_i32_0 : i32, i32
  }
  func.func @transform_5(%arg0: i32) -> (i32, i32) {
    %c0_i32 = arith.constant 0 : i32
    %c0_i32_0 = arith.constant 0 : i32
    %c0_i32_1 = arith.constant 0 : i32
    return %c0_i32, %c0_i32_0 : i32, i32
  }
  func.func @transform_6(%arg0: i32) -> (i32, i32) {
    %c0_i32 = arith.constant 0 : i32
    %c0_i32_0 = arith.constant 0 : i32
    return %c0_i32, %arg0 : i32, i32
  }
  func.func @transform_7(%arg0: i32) -> (i32, i32) {
    %c0_i32 = arith.constant 0 : i32
    %c0_i32_0 = arith.constant 0 : i32
    return %c0_i32, %arg0 : i32, i32
  }
  func.func @transform_8(%arg0: i32) -> (i32, i32, i32) {
    %c0_i32 = arith.constant 0 : i32
    %c0_i32_0 = arith.constant 0 : i32
    %c0_i32_1 = arith.constant 0 : i32
    return %arg0, %c0_i32, %c0_i32_0 : i32, i32, i32
  }
}

module attributes {stable_mosaic.version = 11 : i64} {
  func.func @_gate_psi_kernel(%arg0: i32, %arg1: memref<16x128xf32, #tpu.memory_space<vmem>>, %arg2: memref<16x128xf32, #tpu.memory_space<vmem>>, %arg3: memref<16x1xf32, #tpu.memory_space<vmem>>, %arg4: memref<16x1xf32, #tpu.memory_space<vmem>>, %arg5: memref<16x1xf32, #tpu.memory_space<vmem>>, %arg6: memref<16x1xf32, #tpu.memory_space<vmem>>, %arg7: memref<16x1xf32, #tpu.memory_space<vmem>>, %arg8: memref<1x1xf32, #tpu.memory_space<vmem>>, %arg9: memref<1x128xf32, #tpu.memory_space<vmem>>) attributes {dimension_semantics = [#tpu.dimension_semantics<parallel>], iteration_bounds = array<i64: 4>, scalar_prefetch = 0 : i64, scratch_operands = 0 : i64, tpu.core_type = #tpu.core_type<tc>, window_params = [{transform_indices = @transform_0, window_bounds = array<i64: 16, 128>}, {transform_indices = @transform_1, window_bounds = array<i64: 16, 128>}, {pipeline_mode = #tpu.pipeline_mode<synchronous>, transform_indices = @transform_2, window_bounds = array<i64: 16, 1>}, {pipeline_mode = #tpu.pipeline_mode<synchronous>, transform_indices = @transform_3, window_bounds = array<i64: 16, 1>}, {pipeline_mode = #tpu.pipeline_mode<synchronous>, transform_indices = @transform_4, window_bounds = array<i64: 16, 1>}, {pipeline_mode = #tpu.pipeline_mode<synchronous>, transform_indices = @transform_5, window_bounds = array<i64: 16, 1>}, {pipeline_mode = #tpu.pipeline_mode<synchronous>, transform_indices = @transform_6, window_bounds = array<i64: 16, 1>}, {pipeline_mode = #tpu.pipeline_mode<synchronous>, transform_indices = @transform_7, window_bounds = array<i64: 1, 1>}, {transform_indices = @transform_8, window_bounds = array<i64: 1, 128>}]} {
    %c0 = arith.constant 0 : index
    %c0_0 = arith.constant 0 : index
    %0 = vector.load %arg1[%c0, %c0_0] : memref<16x128xf32, #tpu.memory_space<vmem>>, vector<16x128xf32>
    %c0_1 = arith.constant 0 : index
    %c0_2 = arith.constant 0 : index
    %1 = vector.load %arg3[%c0_1, %c0_2] : memref<16x1xf32, #tpu.memory_space<vmem>>, vector<16x1xf32>
    %2 = vector.broadcast %1 : vector<16x1xf32> to vector<16x128xf32>
    %3 = arith.mulf %0, %2 : vector<16x128xf32>
    %c0_3 = arith.constant 0 : index
    %c0_4 = arith.constant 0 : index
    %4 = vector.load %arg4[%c0_3, %c0_4] : memref<16x1xf32, #tpu.memory_space<vmem>>, vector<16x1xf32>
    %5 = vector.broadcast %4 : vector<16x1xf32> to vector<16x128xf32>
    %6 = arith.addf %3, %5 : vector<16x128xf32>
    %c0_5 = arith.constant 0 : index
    %c0_6 = arith.constant 0 : index
    %7 = vector.load %arg2[%c0_5, %c0_6] : memref<16x128xf32, #tpu.memory_space<vmem>>, vector<16x128xf32>
    %c0_7 = arith.constant 0 : index
    %c0_8 = arith.constant 0 : index
    %8 = vector.load %arg5[%c0_7, %c0_8] : memref<16x1xf32, #tpu.memory_space<vmem>>, vector<16x1xf32>
    %9 = vector.broadcast %8 : vector<16x1xf32> to vector<16x128xf32>
    %10 = arith.mulf %7, %9 : vector<16x128xf32>
    %11 = arith.addf %6, %10 : vector<16x128xf32>
    %c0_9 = arith.constant 0 : index
    %c0_10 = arith.constant 0 : index
    %12 = vector.load %arg6[%c0_9, %c0_10] : memref<16x1xf32, #tpu.memory_space<vmem>>, vector<16x1xf32>
    %13 = vector.broadcast %12 : vector<16x1xf32> to vector<16x128xf32>
    %14 = arith.addf %11, %13 : vector<16x128xf32>
    %cst = arith.constant 0.000000e+00 : f32
    %15 = vector.broadcast %cst : f32 to vector<16x128xf32>
    %16 = arith.maximumf %14, %15 : vector<16x128xf32>
    %c0_11 = arith.constant 0 : index
    %c0_12 = arith.constant 0 : index
    %17 = vector.load %arg7[%c0_11, %c0_12] : memref<16x1xf32, #tpu.memory_space<vmem>>, vector<16x1xf32>
    %18 = vector.broadcast %17 : vector<16x1xf32> to vector<16x128xf32>
    %19 = arith.mulf %16, %18 : vector<16x128xf32>
    %cst_13 = arith.constant dense<0.000000e+00> : vector<128xf32>
    %20 = vector.multi_reduction <add>, %19, %cst_13 [0] : vector<16x128xf32> to vector<128xf32>
    %21 = vector.shape_cast %20 : vector<128xf32> to vector<1x128xf32>
    %c0_14 = arith.constant 0 : index
    %c0_15 = arith.constant 0 : index
    %22 = vector.load %arg8[%c0_14, %c0_15] : memref<1x1xf32, #tpu.memory_space<vmem>>, vector<1x1xf32>
    %23 = vector.broadcast %22 : vector<1x1xf32> to vector<1x128xf32>
    %24 = arith.addf %21, %23 : vector<1x128xf32>
    %c0_16 = arith.constant 0 : index
    %c0_17 = arith.constant 0 : index
    %25 = vector.load %arg9[%c0_16, %c0_17] : memref<1x128xf32, #tpu.memory_space<vmem>>, vector<1x128xf32>
    tpu.vector_store %arg9[%c0_16, %c0_17], %24 {strides = array<i32>} : memref<1x128xf32, #tpu.memory_space<vmem>>, vector<1x128xf32>,
    return
  }
  func.func @transform_0(%arg0: i32) -> (i32, i32) {
    %c0_i32 = arith.constant 0 : i32
    %c0_i32_0 = arith.constant 0 : i32
    return %c0_i32, %arg0 : i32, i32
  }
  func.func @transform_1(%arg0: i32) -> (i32, i32) {
    %c0_i32 = arith.constant 0 : i32
    %c0_i32_0 = arith.constant 0 : i32
    return %c0_i32, %arg0 : i32, i32
  }
  func.func @transform_2(%arg0: i32) -> (i32, i32) {
    %c0_i32 = arith.constant 0 : i32
    %c0_i32_0 = arith.constant 0 : i32
    %c0_i32_1 = arith.constant 0 : i32
    return %c0_i32, %c0_i32_0 : i32, i32
  }
  func.func @transform_3(%arg0: i32) -> (i32, i32) {
    %c0_i32 = arith.constant 0 : i32
    %c0_i32_0 = arith.constant 0 : i32
    %c0_i32_1 = arith.constant 0 : i32
    return %c0_i32, %c0_i32_0 : i32, i32
  }
  func.func @transform_4(%arg0: i32) -> (i32, i32) {
    %c0_i32 = arith.constant 0 : i32
    %c0_i32_0 = arith.constant 0 : i32
    %c0_i32_1 = arith.constant 0 : i32
    return %c0_i32, %c0_i32_0 : i32, i32
  }
  func.func @transform_5(%arg0: i32) -> (i32, i32) {
    %c0_i32 = arith.constant 0 : i32
    %c0_i32_0 = arith.constant 0 : i32
    %c0_i32_1 = arith.constant 0 : i32
    return %c0_i32, %c0_i32_0 : i32, i32
  }
  func.func @transform_6(%arg0: i32) -> (i32, i32) {
    %c0_i32 = arith.constant 0 : i32
    %c0_i32_0 = arith.constant 0 : i32
    %c0_i32_1 = arith.constant 0 : i32
    return %c0_i32, %c0_i32_0 : i32, i32
  }
  func.func @transform_7(%arg0: i32) -> (i32, i32) {
    %c0_i32 = arith.constant 0 : i32
    %c0_i32_0 = arith.constant 0 : i32
    %c0_i32_1 = arith.constant 0 : i32
    return %c0_i32, %c0_i32_0 : i32, i32
  }
  func.func @transform_8(%arg0: i32) -> (i32, i32) {
    %c0_i32 = arith.constant 0 : i32
    %c0_i32_0 = arith.constant 0 : i32
    return %c0_i32, %arg0 : i32, i32
  }
}

module attributes {stable_mosaic.version = 11 : i64} {
  func.func @_gate_apply_kernel(%arg0: i32, %arg1: memref<32x128xf32, #tpu.memory_space<vmem>>, %arg2: memref<1x128xf32, #tpu.memory_space<vmem>>, %arg3: memref<1x1xf32, #tpu.memory_space<vmem>>, %arg4: memref<1x1xf32, #tpu.memory_space<vmem>>, %arg5: memref<32x128xf32, #tpu.memory_space<vmem>>) attributes {dimension_semantics = [#tpu.dimension_semantics<parallel>], iteration_bounds = array<i64: 4>, scalar_prefetch = 0 : i64, scratch_operands = 0 : i64, tpu.core_type = #tpu.core_type<tc>, window_params = [{transform_indices = @transform_0, window_bounds = array<i64: 32, 128>}, {transform_indices = @transform_1, window_bounds = array<i64: 1, 128>}, {pipeline_mode = #tpu.pipeline_mode<synchronous>, transform_indices = @transform_2, window_bounds = array<i64: 1, 1>}, {pipeline_mode = #tpu.pipeline_mode<synchronous>, transform_indices = @transform_3, window_bounds = array<i64: 1, 1>}, {transform_indices = @transform_4, window_bounds = array<i64: 32, 128>}]} {
    %c0 = arith.constant 0 : index
    %c0_0 = arith.constant 0 : index
    %0 = vector.load %arg2[%c0, %c0_0] : memref<1x128xf32, #tpu.memory_space<vmem>>, vector<1x128xf32>
    %c0_1 = arith.constant 0 : index
    %c0_2 = arith.constant 0 : index
    %1 = vector.load %arg3[%c0_1, %c0_2] : memref<1x1xf32, #tpu.memory_space<vmem>>, vector<1x1xf32>
    %2 = vector.broadcast %1 : vector<1x1xf32> to vector<1x128xf32>
    %3 = arith.mulf %0, %2 : vector<1x128xf32>
    %c0_3 = arith.constant 0 : index
    %c0_4 = arith.constant 0 : index
    %4 = vector.load %arg4[%c0_3, %c0_4] : memref<1x1xf32, #tpu.memory_space<vmem>>, vector<1x1xf32>
    %5 = vector.broadcast %4 : vector<1x1xf32> to vector<1x128xf32>
    %6 = arith.addf %3, %5 : vector<1x128xf32>
    %7 = arith.negf %6 : vector<1x128xf32>
    %8 = math.exp %7 : vector<1x128xf32>
    %cst = arith.constant 1.000000e+00 : f32
    %9 = vector.broadcast %cst : f32 to vector<1x128xf32>
    %10 = arith.addf %9, %8 : vector<1x128xf32>
    %11 = arith.divf %9, %10 : vector<1x128xf32>
    %c0_5 = arith.constant 0 : index
    %c0_6 = arith.constant 0 : index
    %12 = vector.load %arg1[%c0_5, %c0_6] : memref<32x128xf32, #tpu.memory_space<vmem>>, vector<32x128xf32>
    %13 = vector.broadcast %11 : vector<1x128xf32> to vector<32x128xf32>
    %14 = arith.mulf %12, %13 : vector<32x128xf32>
    %c0_7 = arith.constant 0 : index
    %c0_8 = arith.constant 0 : index
    %15 = vector.load %arg5[%c0_7, %c0_8] : memref<32x128xf32, #tpu.memory_space<vmem>>, vector<32x128xf32>
    tpu.vector_store %arg5[%c0_7, %c0_8], %14 {strides = array<i32>} : memref<32x128xf32, #tpu.memory_space<vmem>>, vector<32x128xf32>,
    return
  }
  func.func @transform_0(%arg0: i32) -> (i32, i32) {
    %c0_i32 = arith.constant 0 : i32
    %c0_i32_0 = arith.constant 0 : i32
    return %c0_i32, %arg0 : i32, i32
  }
  func.func @transform_1(%arg0: i32) -> (i32, i32) {
    %c0_i32 = arith.constant 0 : i32
    %c0_i32_0 = arith.constant 0 : i32
    return %c0_i32, %arg0 : i32, i32
  }
  func.func @transform_2(%arg0: i32) -> (i32, i32) {
    %c0_i32 = arith.constant 0 : i32
    %c0_i32_0 = arith.constant 0 : i32
    %c0_i32_1 = arith.constant 0 : i32
    return %c0_i32, %c0_i32_0 : i32, i32
  }
  func.func @transform_3(%arg0: i32) -> (i32, i32) {
    %c0_i32 = arith.constant 0 : i32
    %c0_i32_0 = arith.constant 0 : i32
    %c0_i32_1 = arith.constant 0 : i32
    return %c0_i32, %c0_i32_0 : i32, i32
  }
  func.func @transform_4(%arg0: i32) -> (i32, i32) {
    %c0_i32 = arith.constant 0 : i32
    %c0_i32_0 = arith.constant 0 : i32
    return %c0_i32, %arg0 : i32, i32
  }
}

</mosaic_0001>

<bundles_post_ra>
// kernel: attention_block_forward.4
= control target key start
LH: loop header
LB: loop body
LE: loop exit
PB: predicated region body
PF: predicated region fallthrough
CT: control target
= control target key end

     0   :  { %s778_s0 = inlined_call_operand.vmem [shape: f32[16,512], index: 0, kind: input, shape index: {}]   ;;  %s779_s1 = inlined_call_operand.vmem [shape: f32[16,512], index: 1, kind: input, shape index: {}]   ;;  %s780_s2 = inlined_call_operand.vmem [shape: f32[16,1], index: 2, kind: input, shape index: {}]   ;;  %s781_s3 = inlined_call_operand.vmem [shape: f32[16,1], index: 3, kind: input, shape index: {}]   ;;  %s782_s4 = inlined_call_operand.vmem [shape: f32[16,1], index: 4, kind: input, shape index: {}]   ;;  %s783_s5 = inlined_call_operand.vmem [shape: f32[16,1], index: 5, kind: input, shape index: {}]   ;;  %s784_s6 = inlined_call_operand.vmem [shape: f32[16,1], index: 6, kind: input, shape index: {}]   ;;  %s785_s7 = inlined_call_operand.<no memory space> [shape: f32[1,1], index: 7, kind: input, shape index: {}]   ;;  %s786_s8 = inlined_call_operand.vmem [shape: f32[1,512], index: 8, kind: output, shape index: {}]  }
   0x1   :  { %v13_v0 = vstv %s785_s7 }
   0x2   :  { %14 = vst [vmem:[#allocation2] sm:$0x1] %v13_v0 }
   0x3   :  { %s681_s29 = smov 0   ;;  %s683_s30 = smov 0  }
   0x4   :  { %s685_s9 = smov 0  }
   0x5 LB: > { %s567_s7 = sadd.s32 4294967295, %s630_s9   ;;  %s698_s10 = sadd.s32 1, %s630_s9   ;;  %s630_s9 = sphi %s685_s9, %s790_s9   ;;  %s626_s30 = sphi %s683_s30, %s789_s30   ;;  %s622_s29 = sphi %s681_s29, %s788_s29  }
   0x6   : > { %s24_s11 = ssub.s32 %s630_s9, %s698_s10  ;;  %s27_s12 = sadd.s32 1, %s626_s30 }
   0x7   : > { %p25_p0 = scmp.eq.s32.totalorder %s24_s11, 0  ;;  %p34_p1 = scmp.ne.s32.totalorder %s626_s30, %s622_s29 }
   0x8   : > { %p35_p2 = scmp.eq.s32.totalorder %s630_s9, 0  ;;  %p570_p4 = scmp.ge.s32.totalorder %s630_s9, 4 }
   0x9   : > { %s707_s13 = scalar_select %p25_p0, %s626_s30, %s27_s12  }
   0xa   : > { %p709_p3 = por %p35_p2, %p34_p1  ;;  %256 = sbr.rel (%p570_p4) target bundleno = 27 (0x1b), region = 40 }
   0xf   : > { %259 = sbr.rel (!%p709_p3) target bundleno = 21 (0x15), region = 44  ;;  %s261_s15 = sand.u32 (%p709_p3), 1, %s626_s30  }
  0x10   : > { %s572_s16 = sshll.u32 (%p709_p3), %s630_s9, 3  ;;  %s571_s17 = sshll.u32 (%p709_p3), %s261_s15, 4 }
  0x11   : > { %s265_s20 = scalar_lea.vmem (%p709_p3), %s778_s0, %s572_s16  ;;  %s263_s21 = scalar_lea.vmem (%p709_p3), [#allocation3], %s571_s17 }
  0x12   : > { %v296_v1 = vld [vmem:[%s265_s20] sm:$0xff] (%p709_p3) }
  0x13   : > { %v298_v2 = vld [vmem:[%s265_s20 + $0x20] sm:$0xff] (%p709_p3)  ;;  %297 = vst [vmem:[%s263_s21] sm:$0xff] (%p709_p3), %v296_v1 }
  0x14   : > { %299 = vst [vmem:[%s263_s21 + $0x8] sm:$0xff] %v298_v2 }
  0x15 PF: > { %305 = sbr.rel (!%p709_p3) target bundleno = 27 (0x1b), region = 82  ;;  %s307_s22 = sand.u32 (%p709_p3), 1, %s626_s30  }
  0x16   : > { %s574_s23 = sshll.u32 (%p709_p3), %s630_s9, 3  ;;  %s573_s24 = sshll.u32 (%p709_p3), %s307_s22, 4 }
  0x17   : > { %s311_s27 = scalar_lea.vmem (%p709_p3), %s779_s1, %s574_s23  ;;  %s309_s28 = scalar_lea.vmem (%p709_p3), [#allocation4], %s573_s24 }
  0x18   : > { %v342_v3 = vld [vmem:[%s311_s27] sm:$0xff] (%p709_p3) }
  0x19   : > { %v344_v4 = vld [vmem:[%s311_s27 + $0x20] sm:$0xff] (%p709_p3)  ;;  %343 = vst [vmem:[%s309_s28] sm:$0xff] (%p709_p3), %v342_v3 }
  0x1a   : > { %345 = vst [vmem:[%s309_s28 + $0x8] sm:$0xff] %v344_v4 }
  0x1b PF: > { %p575_p5 = scmp.ge.s32.totalorder %s630_s9, 1  ;;  %p350_p6 = scmp.lt.s32.totalorder %s630_s9, 5 }
  0x1d   : > { %p351_p7 = pnand %p575_p5, %p350_p6 }
  0x1e   : > { %s357_s15 = sand.u32 (!%p351_p7), 1, %s622_s29   ;;  %p399_p8 = scmp.lt.s32.totalorder (!%p351_p7), %s567_s7, 3 }
  0x1f   : > { %354 = sbr.rel (%p351_p7) target bundleno = 196 (0xc4), region = 120  ;;  %s576_s16 = sshll.u32 (!%p351_p7), %s357_s15, 4 }
  0x20   : > { %s359_s17 = scalar_lea.vmem (!%p351_p7), [#allocation3], %s576_s16  ;;  %s366_s18 = scalar_lea.vmem (!%p351_p7), [#allocation4], %s576_s16 }
  0x24   : > { %v418_v5 = vld [vmem:[%s781_s3] sm:$0xff]  ;;  %v632_v7 = vmov 0   ;;  %v419_v9 = vld [vmem:[%s781_s3 + $0x8] sm:$0xff]  ;;  %s792_s7 = smov (!%p399_p8, %s567_s7), 3 }
  0x25   : > { %v404_v6 = vld [vmem:[%s780_s2] sm:$0xff]  ;;  %606 = vset.pattern.permute.xlu1 %v632_v7  ;;  %605 = vset.pattern.permute.xlu0 %v632_v7  ;;  %v405_v10 = vld [vmem:[%s780_s2 + $0x8] sm:$0xff]  ;;  %s401_s20 = scalar_lea.vmem %s786_s8, %s792_s7 }
  0x26   : > { %v434_v8 = vld [vmem:[%s782_s4] sm:$0xff]  ;;  %422 = vperm.xlu1 %606, %v418_v5   ;;  %408 = vperm.xlu0 %605, %v404_v6   ;;  %v435_v11 = vld [vmem:[%s782_s4 + $0x8] sm:$0xff] }
  0x27   : > { %607 = vset.pattern.permute.xlu2 %v632_v7  ;;  %v451_v12 = vld [vmem:[%s783_s5 + $0x8] sm:$0xff]  ;;  %v450_v13 = vld [vmem:[%s783_s5] sm:$0xff] }
  0x28   : > { %438 = vperm.xlu2 %607, %v434_v8   ;;  %v466_v14 = vld [vmem:[%s784_s6] sm:$0xff]  ;;  %v467_v16 = vld [vmem:[%s784_s6 + $0x8] sm:$0xff] }
  0x29   : > { %v487_v15 = vld [vmem:[#allocation2] sm:$0x1]  ;;  %v402_v20 = vld [vmem:[%s359_s17] sm:$0xff] }
  0x2a   : > { %v403_v21 = vld [vmem:[%s359_s17 + $0x8] sm:$0xff]  ;;  %v432_v23 = vld [vmem:[%s366_s18] sm:$0xff] }
  0x2b   : > { %v433_v29 = vld [vmem:[%s366_s18 + $0x8] sm:$0xff] }
  0x2e   : > { %427 = vperm.xlu1 %606, %v419_v9   ;;  %413 = vperm.xlu0 %605, %v405_v10  }
  0x30   : > { %443 = vperm.xlu2 %607, %v435_v11  }
  0x36   : > { %459 = vperm.xlu1 %606, %v451_v12   ;;  %454 = vperm.xlu0 %605, %v450_v13  }
  0x38   : > { %470 = vperm.xlu2 %607, %v466_v14  }
  0x3e   : > { %490 = vperm.xlu1 %606, %v487_v15   ;;  %475 = vperm.xlu0 %605, %v467_v16  }
  0x82   : > { %v439_v19 = vpop.permute.xlu2 %438 }
  0x83   : > { %v446_v27 = vmul.f32 %v439_v19, %v432_v23 }
  0x8a   : > { %v444_v31 = vpop.permute.xlu2 %443 }
  0x8b   : > { %v447_v32 = vmul.f32 %v444_v31, %v433_v29 }
  0x92   : > { %v471_v41 = vpop.permute.xlu2 %470 }
  0x98   : > { %v423_v17 = vpop.permute.xlu1 %422  ;;  %v409_v18 = vpop.permute.xlu0 %408 }
  0x99   : > { %v416_v22 = vmul.f32 %v409_v18, %v402_v20 }
  0x9b   : > { %v430_v28 = vadd.f32 %v423_v17, %v416_v22 }
  0x9d   : > { %v448_v33 = vadd.f32 %v446_v27, %v430_v28 }
  0xa0   : > { %v428_v24 = vpop.permute.xlu1 %427  ;;  %v414_v25 = vpop.permute.xlu0 %413 }
  0xa1   : > { %v417_v26 = vmul.f32 %v414_v25, %v403_v21 }
  0xa3   : > { %v431_v30 = vadd.f32 %v428_v24, %v417_v26 }
  0xa5   : > { %v449_v36 = vadd.f32 %v447_v32, %v431_v30 }
  0xa8   : > { %v460_v34 = vpop.permute.xlu1 %459  ;;  %v455_v35 = vpop.permute.xlu0 %454 }
  0xa9   : > { %v462_v37 = vadd.f32 %v455_v35, %v448_v33  ;;  %v463_v38 = vadd.f32 %v460_v34, %v449_v36 }
  0xab   : > { %v464_v39 = vmax.f32 %v462_v37, 0.0  ;;  %v465_v40 = vmax.f32 %v463_v38, 0.0 }
  0xad   : > { %v478_v43 = vmul.f32 %v471_v41, %v464_v39 }
  0xb0   : > { %v476_v42 = vpop.permute.xlu0 %475  ;;  %v491_v50 = vpop.permute.xlu1 %490 }
  0xb1   : > { %v479_v44 = vmul.f32 %v476_v42, %v465_v40  ;;  %v493_v52 = vperm.slane %v491_v50, 0 }
  0xb3   : > { %v480_v45 = vadd.f32 %v479_v44, %v478_v43 }
  0xb5   : > { %v481_v46 = vrot.slane %v480_v45, 4 }
  0xb7   : > { %v482_v47 = vadd.f32 %v481_v46, %v480_v45 }
  0xb9   : > { %v483_v48 = vrot.slane %v482_v47, 2 }
  0xbb   : > { %v484_v49 = vadd.f32 %v483_v48, %v482_v47 }
  0xbd   : > { %v485_v51 = vrot.slane %v484_v49, 1 }
  0xbf   : > { %v486_v53 = vadd.f32 %v485_v51, %v484_v49 }
  0xc1   : > { %v494_v54 = vadd.f32 %v493_v52, %v486_v53 }
  0xc3   : > { %495 = vst [vmem:[%s401_s20] sm:$0x1] %v494_v54 }
  0xc4 PF: > { %p17_p9 = scmp.ge.s32.totalorder %s698_s10, 6   ;;  %s788_s29 = smov %s626_s30 }
  0xc5   : > { %s789_s30 = smov %s707_s13  ;;  %s790_s9 = smov %s698_s10 }
  0xc6   :  { %19 = sbr.rel (!%p17_p9) target bundleno = 5 (0x5), region = 171 }

// kernel: attention_block_forward.5
= control target key start
LH: loop header
LB: loop body
LE: loop exit
PB: predicated region body
PF: predicated region fallthrough
CT: control target
= control target key end

     0   :  { %s592_s0 = inlined_call_operand.vmem [shape: f32[32,512], index: 0, kind: input, shape index: {}]   ;;  %s593_s1 = inlined_call_operand.vmem [shape: f32[1,512], index: 1, kind: input, shape index: {}]   ;;  %s594_s2 = inlined_call_operand.<no memory space> [shape: f32[1,1], index: 2, kind: input, shape index: {}]   ;;  %s595_s4 = inlined_call_operand.vmem [shape: f32[32,512], index: 4, kind: output, shape index: {}]   ;;  %s596_s3 = inlined_call_operand.<no memory space> [shape: f32[1,1], index: 3, kind: input, shape index: {}]  }
   0x1   :  { %v9_v0 = vstv %s594_s2  ;;  %v11_v1 = vstv %s596_s3 }
   0x2   :  { %10 = vst [vmem:[#allocation2] sm:$0x1] %v9_v0 }
   0x3   :  { %12 = vst [vmem:[#allocation3] sm:$0x1] %v11_v1 }
   0x4   :  { %s527_s19 = smov 0   ;;  %s529_s20 = smov 0  }
   0x5   :  { %s531_s21 = smov 0  }
   0x6 LB: > { %s543_s2 = sadd.s32 4294967295, %s493_s21   ;;  %s546_s3 = sadd.s32 1, %s493_s21   ;;  %s493_s21 = sphi %s531_s21, %s600_s21   ;;  %s489_s20 = sphi %s529_s20, %s599_s20   ;;  %s485_s19 = sphi %s527_s19, %s598_s19  }
   0x7   : > { %s22_s22 = ssub.s32 %s493_s21, %s546_s3  ;;  %s25_s23 = sadd.s32 1, %s489_s20 }
   0x8   : > { %p23_p0 = scmp.eq.s32.totalorder %s22_s22, 0  ;;  %p32_p1 = scmp.ne.s32.totalorder %s489_s20, %s485_s19 }
   0x9   : > { %p33_p2 = scmp.eq.s32.totalorder %s493_s21, 0  ;;  %p130_p3 = scmp.eq.s32.totalorder %s543_s2, 3 }
   0xa   : > { %s556_s24 = scalar_select %p23_p0, %s489_s20, %s25_s23  }
   0xb   : > { %p34_p4 = por %p33_p2, %p32_p1  ;;  %p558_p5 = por %p130_p3, %p32_p1 }
   0xc   : > { %p430_p6 = scmp.ge.s32.totalorder %s493_s21, 4 }
   0xe   : > { %158 = sbr.rel (%p430_p6) target bundleno = 27 (0x1b), region = 24 }
  0x13   : > { %161 = sbr.rel (!%p34_p4) target bundleno = 27 (0x1b), region = 28  ;;  %s163_s26 = sand.u32 (%p34_p4), 1, %s489_s20  }
  0x14   : > { %s432_s27 = sshll.u32 (%p34_p4), %s493_s21, 3  ;;  %s431_s28 = sshll.u32 (%p34_p4), %s163_s26, 5 }
  0x15   : > { %s167_s5 = scalar_lea.vmem (%p34_p4), %s592_s0, %s432_s27  ;;  %s165_s6 = scalar_lea.vmem (%p34_p4), [#allocation4], %s431_s28 }
  0x16   : > { %v202_v2 = vld [vmem:[%s167_s5] sm:$0xff] (%p34_p4) }
  0x17   : > { %v204_v3 = vld [vmem:[%s167_s5 + $0x20] sm:$0xff] (%p34_p4)  ;;  %203 = vst [vmem:[%s165_s6] sm:$0xff] (%p34_p4), %v202_v2 }
  0x18   : > { %v206_v4 = vld [vmem:[%s167_s5 + $0x40] sm:$0xff]  ;;  %205 = vst [vmem:[%s165_s6 + $0x8] sm:$0xff] %v204_v3 }
  0x19   : > { %v208_v5 = vld [vmem:[%s167_s5 + $0x60] sm:$0xff]  ;;  %207 = vst [vmem:[%s165_s6 + $0x10] sm:$0xff] %v206_v4 }
  0x1a   : > { %209 = vst [vmem:[%s165_s6 + $0x18] sm:$0xff] %v208_v5 }
  0x1b PF: > { %p433_p7 = scmp.ge.s32.totalorder %s493_s21, 1  ;;  %p220_p8 = scmp.lt.s32.totalorder %s493_s21, 5 }
  0x1d   : > { %p221_p9 = pnand %p433_p7, %p220_p8 }
  0x1e   : > { %p254_p10 = scmp.lt.s32.totalorder (!%p221_p9), %s543_s2, 3  ;;  %s227_s11 = sand.u32 (!%p221_p9), 1, %s485_s19  }
  0x1f   : > { %224 = sbr.rel (%p221_p9) target bundleno = 209 (0xd1), region = 70  ;;  %s434_s12 = sshll.u32 (!%p221_p9), %s227_s11, 5 }
  0x20   : > { %s229_s13 = scalar_lea.vmem (!%p221_p9), [#allocation4], %s434_s12  ;;  %s253_s14 = scalar_lea.vmem (!%p221_p9), [#allocation5], %s434_s12 }
  0x24   : > { %v258_v6 = vld [vmem:[#allocation2] sm:$0x1]  ;;  %v495_v7 = vmov 0   ;;  %v266_v8 = vld [vmem:[#allocation3] sm:$0x1]  ;;  %s255_s7 = scalar_select %p254_p10, %s543_s2, 3 }
  0x25   : > { %466 = vset.pattern.permute.xlu0 %v495_v7  ;;  %v293_v29 = vld [vmem:[%s229_s13] sm:$0xff]  ;;  %v294_v30 = vld [vmem:[%s229_s13 + $0x8] sm:$0xff]  ;;  %v295_v31 = vld [vmem:[%s229_s13 + $0x10] sm:$0xff]  ;;  %s438_s15 = sshll.u32 (%p558_p5), %s543_s2, 3 }
  0x26   : > { %261 = vperm.xlu0 %466, %v258_v6   ;;  %s256_s10 = scalar_lea.vmem %s593_s1, %s255_s7  ;;  %v296_v32 = vld [vmem:[%s229_s13 + $0x18] sm:$0xff]  ;;  %s316_s18 = scalar_lea.vmem (%p558_p5), %s595_s4, %s438_s15 }
  0x27   : > { %v257_v11 = vld [vmem:[%s256_s10] sm:$0x1] }
  0x2e   : > { %269 = vperm.xlu0 %466, %v266_v8  }
  0x98   : > { %v262_v9 = vpop.permute.xlu0 %261 }
  0x99   : > { %v264_v10 = vperm.slane %v262_v9, 0 }
  0x9b   : > { %v265_v13 = vmul.f32 %v264_v10, %v257_v11 }
  0xa0   : > { %v270_v12 = vpop.permute.xlu0 %269 }
  0xa1   : > { %v272_v14 = vperm.slane %v270_v12, 0 }
  0xa3   : > { %v273_v15 = vadd.f32 %v272_v14, %v265_v13 }
  0xa5   : > { %v436_v16 = vmul.f32 -1.442695, %v273_v15 }
  0xa7   : > { %467 = vpow2.f32 %v436_v16 }
  0xad   : > { %v468_v17 = vpop.eup %467 }
  0xae   : > { %v277_v18 = vadd.f32 1.0, %v468_v17 }
  0xb0   : > { %469 = vrcp.f32 %v277_v18  ;;  %v289_v22 = vand.u32 2147483648, %v277_v18  ;;  %v287_v24 = vand.u32 2147483647, %v277_v18  ;;  %vm283_vm1 = vweird.f32 %v277_v18 }
  0xb2   : > { %v290_v26 = vor.u32 1.1754944e-38, %v289_v22  ;;  %vm288_vm3 = vcmp.eq.f32.partialorder %v287_v24, 8.507059e+37 }
  0xb6   : > { %v470_v19 = vpop.eup %469 }
  0xb7   : > { %v279_v20 = vmul.f32 %v470_v19, %v277_v18  ;;  %vm284_vm0 = vweird.f32 %v470_v19 }
  0xb8   : > { %vm285_vm2 = vmor %vm283_vm1, %vm284_vm0 }
  0xb9   : > { %v280_v21 = vsub.f32 1.0, %v279_v20 }
  0xbb   : > { %v281_v23 = vmul.f32 %v470_v19, %v280_v21 }
  0xbd   : > { %v282_v25 = vadd.f32 %v470_v19, %v281_v23 }
  0xbf   : > { %v286_v27 = vsel %vm285_vm2, %v470_v19, %v282_v25 }
  0xc0   : > { %v291_v28 = vsel %vm288_vm3, %v290_v26, %v286_v27 }
  0xc1   : > { %v298_v33 = vperm.slane %v291_v28, 0 }
  0xc3   : > { %v300_v34 = vmul.f32 %v298_v33, %v293_v29  ;;  %v301_v35 = vmul.f32 %v298_v33, %v294_v30  ;;  %v302_v36 = vmul.f32 %v298_v33, %v295_v31  ;;  %v303_v37 = vmul.f32 %v298_v33, %v296_v32 }
  0xc4   : > { %314 = sbr.rel (!%p558_p5) target bundleno = 209 (0xd1), region = 78 }
  0xc5   : > { %304 = vst [vmem:[%s253_s14] sm:$0xff] %v300_v34 }
  0xc6   : > { %305 = vst [vmem:[%s253_s14 + $0x8] sm:$0xff] %v301_v35 }
  0xc7   : > { %306 = vst [vmem:[%s253_s14 + $0x10] sm:$0xff] %v302_v36 }
  0xc8   : > { %307 = vst [vmem:[%s253_s14 + $0x18] sm:$0xff] %v303_v37 }
  0xcc   : > { %v351_v38 = vld [vmem:[%s253_s14] sm:$0xff] }
  0xcd   : > { %v353_v39 = vld [vmem:[%s253_s14 + $0x8] sm:$0xff]  ;;  %352 = vst [vmem:[%s316_s18] sm:$0xff] %v351_v38 }
  0xce   : > { %v355_v40 = vld [vmem:[%s253_s14 + $0x10] sm:$0xff]  ;;  %354 = vst [vmem:[%s316_s18 + $0x20] sm:$0xff] %v353_v39 }
  0xcf   : > { %v357_v41 = vld [vmem:[%s253_s14 + $0x18] sm:$0xff]  ;;  %356 = vst [vmem:[%s316_s18 + $0x40] sm:$0xff] %v355_v40 }
  0xd0   : > { %358 = vst [vmem:[%s316_s18 + $0x60] sm:$0xff] %v357_v41 }
  0xd1 PF: > { %p15_p11 = scmp.ge.s32.totalorder %s546_s3, 6   ;;  %s598_s19 = smov %s489_s20 }
  0xd2   : > { %s599_s20 = smov %s556_s24  ;;  %s600_s21 = smov %s546_s3 }
  0xd3   :  { %17 = sbr.rel (!%p15_p11) target bundleno = 6 (0x6), region = 150 }

// kernel: attention_block_forward.3
= control target key start
LH: loop header
LB: loop body
LE: loop exit
PB: predicated region body
PF: predicated region fallthrough
CT: control target
= control target key end

     0   :  { %s922_s27 = smov 0   ;;  %s924_s28 = smov 0   ;;  %s1050_s0 = inlined_call_operand.vmem [shape: f32[32,512], index: 0, kind: input, shape index: {}]   ;;  %s1051_s1 = inlined_call_operand.vmem [shape: f32[32,512], index: 1, kind: input, shape index: {}]   ;;  %s1052_s2 = inlined_call_operand.vmem [shape: f32[16,32], index: 2, kind: input, shape index: {}]   ;;  %s1053_s3 = inlined_call_operand.vmem [shape: f32[16,1], index: 3, kind: input, shape index: {}]   ;;  %s1054_s4 = inlined_call_operand.vmem [shape: f32[16,32], index: 4, kind: input, shape index: {}]   ;;  %s1055_s5 = inlined_call_operand.vmem [shape: f32[16,1], index: 5, kind: input, shape index: {}]   ;;  %s1056_s6 = inlined_call_operand.vmem [shape: f32[16,512], index: 6, kind: output, shape index: {0}]   ;;  %s1057_s7 = inlined_call_operand.vmem [shape: f32[16,512], index: 7, kind: output, shape index: {1}]   ;;  %s1058_s8 = inlined_call_operand.vmem [shape: f32[4,16,4], index: 8, kind: output, shape index: {2}]  }
   0x1   :  { %s926_s29 = smov 0  }
   0x2 LB: > { %s938_s30 = sadd.s32 4294967295, %s874_s29   ;;  %s941_s9 = sadd.s32 1, %s874_s29   ;;  %s874_s29 = sphi %s926_s29, %s1063_s29   ;;  %s870_s28 = sphi %s924_s28, %s1062_s28   ;;  %s866_s27 = sphi %s922_s27, %s1061_s27  }
   0x3   : > { %s23_s10 = ssub.s32 %s874_s29, %s941_s9  ;;  %s26_s11 = sadd.s32 1, %s870_s28 }
   0x4   : > { %p24_p0 = scmp.eq.s32.totalorder %s23_s10, 0  ;;  %p33_p1 = scmp.ne.s32.totalorder %s870_s28, %s866_s27 }
   0x5   : > { %p34_p2 = scmp.eq.s32.totalorder %s874_s29, 0  ;;  %p173_p3 = scmp.eq.s32.totalorder %s938_s30, 3 }
   0x6   : > { %s951_s12 = scalar_select %p24_p0, %s870_s28, %s26_s11  }
   0x7   : > { %p953_p4 = por %p34_p2, %p33_p1  ;;  %p957_p5 = por %p173_p3, %p33_p1 }
   0x8   : > { %p794_p6 = scmp.ge.s32.totalorder %s874_s29, 4 }
   0xa   : > { %259 = sbr.rel (%p794_p6) target bundleno = 31 (0x1f), region = 32 }
   0xf   : > { %262 = sbr.rel (!%p953_p4) target bundleno = 23 (0x17), region = 36  ;;  %s264_s15 = sand.u32 (%p953_p4), 1, %s870_s28  }
  0x10   : > { %s796_s16 = sshll.u32 (%p953_p4), %s874_s29, 3  ;;  %s795_s17 = sshll.u32 (%p953_p4), %s264_s15, 5 }
  0x11   : > { %s268_s20 = scalar_lea.vmem (%p953_p4), %s1050_s0, %s796_s16  ;;  %s266_s21 = scalar_lea.vmem (%p953_p4), [#allocation2], %s795_s17 }
  0x12   : > { %v303_v0 = vld [vmem:[%s268_s20] sm:$0xff] (%p953_p4) }
  0x13   : > { %v305_v1 = vld [vmem:[%s268_s20 + $0x20] sm:$0xff] (%p953_p4)  ;;  %304 = vst [vmem:[%s266_s21] sm:$0xff] (%p953_p4), %v303_v0 }
  0x14   : > { %v307_v2 = vld [vmem:[%s268_s20 + $0x40] sm:$0xff]  ;;  %306 = vst [vmem:[%s266_s21 + $0x8] sm:$0xff] %v305_v1 }
  0x15   : > { %v309_v3 = vld [vmem:[%s268_s20 + $0x60] sm:$0xff]  ;;  %308 = vst [vmem:[%s266_s21 + $0x10] sm:$0xff] %v307_v2 }
  0x16   : > { %310 = vst [vmem:[%s266_s21 + $0x18] sm:$0xff] %v309_v3 }
  0x17 PF: > { %316 = sbr.rel (!%p953_p4) target bundleno = 31 (0x1f), region = 74  ;;  %s318_s22 = sand.u32 (%p953_p4), 1, %s870_s28  }
  0x18   : > { %s798_s23 = sshll.u32 (%p953_p4), %s874_s29, 3  ;;  %s797_s24 = sshll.u32 (%p953_p4), %s318_s22, 5 }
  0x19   : > { %s322_s10 = scalar_lea.vmem (%p953_p4), %s1051_s1, %s798_s23  ;;  %s320_s11 = scalar_lea.vmem (%p953_p4), [#allocation3], %s797_s24 }
  0x1a   : > { %v357_v4 = vld [vmem:[%s322_s10] sm:$0xff] (%p953_p4) }
  0x1b   : > { %v359_v5 = vld [vmem:[%s322_s10 + $0x20] sm:$0xff] (%p953_p4)  ;;  %358 = vst [vmem:[%s320_s11] sm:$0xff] (%p953_p4), %v357_v4 }
  0x1c   : > { %v361_v6 = vld [vmem:[%s322_s10 + $0x40] sm:$0xff]  ;;  %360 = vst [vmem:[%s320_s11 + $0x8] sm:$0xff] %v359_v5 }
  0x1d   : > { %v363_v7 = vld [vmem:[%s322_s10 + $0x60] sm:$0xff]  ;;  %362 = vst [vmem:[%s320_s11 + $0x10] sm:$0xff] %v361_v6 }
  0x1e   : > { %364 = vst [vmem:[%s320_s11 + $0x18] sm:$0xff] %v363_v7 }
  0x1f PF: > { %p799_p7 = scmp.ge.s32.totalorder %s874_s29, 1  ;;  %p369_p8 = scmp.lt.s32.totalorder %s874_s29, 5 }
  0x21   : > { %p370_p9 = pnand %p799_p7, %p369_p8 }
  0x22   : > { %s376_s13 = sand.u32 (!%p370_p9), 1, %s866_s27   ;;  %p428_p10 = scmp.lt.s32.totalorder (!%p370_p9), %s938_s30, 3 }
  0x23   : > { %373 = sbr.rel (%p370_p9) target bundleno = 341 (0x155), region = 112  ;;  %s800_s17 = sshll.u32 (!%p370_p9), %s376_s13, 5 }
  0x24   : > { %s378_s29 = scalar_lea.vmem (!%p370_p9), [#allocation2], %s800_s17  ;;  %s385_s20 = scalar_lea.vmem (!%p370_p9), [#allocation3], %s800_s17 }
  0x25   : > { %s802_s19 = sshll.u32 (!%p370_p9), %s376_s13, 4 }
  0x28   : > { %v439_v8 = vld [vmem:[%s1053_s3] sm:$0xff]  ;;  %v876_v9 = vmov 0   ;;  %v438_v11 = vld [vmem:[%s378_s29 + $0x18] sm:$0xff]  ;;  %v437_v12 = vld [vmem:[%s378_s29 + $0x10] sm:$0xff]  ;;  %vm451_vm0 = vcmask 261120   ;;  %s429_s27 = scalar_select %p428_p10, %s938_s30, 3 }
  0x29   : > { %850 = vset.pattern.permute.xlu0 %v876_v9  ;;  %851 = vset.pattern.permute.xlu1 %v876_v9  ;;  %v487_v10 = vld [vmem:[%s1055_s5] sm:$0xff]  ;;  %v486_v13 = vld [vmem:[%s385_s20 + $0x18] sm:$0xff]  ;;  %v485_v14 = vld [vmem:[%s385_s20 + $0x10] sm:$0xff]  ;;  %vm552_vm1 = vcmask 7168   ;;  %vm555_vm2 = vcmask 15360   ;;  %vm558_vm3 = vcmask 23552  }
  0x2a   : > { %443 = vperm.xlu0 %850, %v439_v8   ;;  %491 = vperm.xlu1 %851, %v487_v10   ;;  %v436_v15 = vld [vmem:[%s378_s29 + $0x8] sm:$0xff]  ;;  %v435_v17 = vld [vmem:[%s378_s29] sm:$0xff]  ;;  %s1011_s29 = scalar_lea.vmem [#allocation4], %s802_s19  ;;  %s816_s13 = sshll.u32 %s429_s27, 4  ;;  %vm561_vm4 = vcmask 31744  }
  0x2b   : > { %470 = vmatpush.msra.mxu0 %v438_v11  ;;  %817 = vmatpush.msra.mxu2 %v438_v11  ;;  %v484_v16 = vld [vmem:[%s385_s20 + $0x8] sm:$0xff]  ;;  %v433_v18 = vld [vmem:[%s1052_s2] sm:$0xff]  ;;  %s432_s23 = scalar_lea.vmem %s1058_s8, %s816_s13  ;;  %s812_s24 = sshll.u32 (%p957_p5), %s938_s30, 3 }
  0x2c   : > { %821 = vmatpush.msra.mxu3 %v486_v13  ;;  %517 = vmatpush.msra.mxu1 %v486_v13  ;;  %v434_v19 = vld [vmem:[%s1052_s2 + $0x8] sm:$0xff]  ;;  %v483_v20 = vld [vmem:[%s385_s20] sm:$0xff]  ;;  %s1014_s20 = scalar_lea.vmem [#allocation5], %s802_s19  ;;  %s581_s10 = scalar_lea.vmem (%p957_p5), %s1056_s6, %s812_s24 }
  0x2d   : > { %471 = vmatpush.msra.mxu0 %v437_v12  ;;  %818 = vmatpush.msra.mxu2 %v437_v12  ;;  %v440_v21 = vld [vmem:[%s1053_s3 + $0x8] sm:$0xff]  ;;  %v481_v23 = vld [vmem:[%s1054_s4] sm:$0xff] }
  0x2e   : > { %822 = vmatpush.msra.mxu3 %v485_v14  ;;  %518 = vmatpush.msra.mxu1 %v485_v14  ;;  %v482_v22 = vld [vmem:[%s1054_s4 + $0x8] sm:$0xff] }
  0x2f   : > { %472 = vmatpush.msra.mxu0 %v436_v15  ;;  %819 = vmatpush.msra.mxu2 %v436_v15  ;;  %v488_v24 = vld [vmem:[%s1055_s5 + $0x8] sm:$0xff] }
  0x30   : > { %823 = vmatpush.msra.mxu3 %v484_v16  ;;  %519 = vmatpush.msra.mxu1 %v484_v16 }
  0x31   : > { %473 = vmatpush.msra.mxu0 %v435_v17  ;;  %820 = vmatpush.msra.mxu2 %v435_v17 }
  0x32   : > { %806 = vmatmul.msk.f32.vlgmr.msra.gmra.mxu0 %vm451_vm0, %v433_v18  ;;  %807 = vmatmul.msk.f32.vlgmr.msra.gmra.mxu2 %vm451_vm0, %v434_v19 }
  0x33   : > { %824 = vmatpush.msra.mxu3 %v483_v20  ;;  %448 = vperm.xlu0 %850, %v440_v21  }
  0x34   : > { %809 = vmatmul.msk.f32.vlgmr.msra.gmra.mxu3 %vm451_vm0, %v482_v22  ;;  %520 = vmatpush.msra.mxu1 %v483_v20 }
  0x35   : > { %808 = vmatmul.msk.f32.vlgmr.msra.gmra.mxu1 %vm451_vm0, %v481_v23  ;;  %496 = vperm.xlu1 %851, %v488_v24  }
  0x9c   : > { %v444_v25 = vpop.permute.xlu0 %443  ;;  %v492_v26 = vpop.permute.xlu1 %491 }
  0xa5   : > { %v449_v32 = vpop.permute.xlu0 %448 }
  0xa7   : > { %v497_v34 = vpop.permute.xlu1 %496 }
  0xaf   : > { %v475_v27 = vpop.f32.mrf.mxu0 }
  0xb0   : > { %v476_v28 = vadd.f32 %v475_v27, %v444_v25 }
  0xb2   : > { %528 = vst [vmem:[%s1011_s29] sm:$0xff] %v476_v28  ;;  %532 = vadd.xlane.f32.xlu2 %v476_v28  ;;  %v536_v29 = vmul.f32 %v476_v28, %v476_v28  ;;  %v522_v30 = vpop.f32.mrf.mxu1 }
  0xb3   : > { %v523_v31 = vadd.f32 %v522_v30, %v492_v26 }
  0xb4   : > { %538 = vadd.xlane.f32.xlu0 %v536_v29 }
  0xb5   : > { %v478_v33 = vpop.f32.mrf.mxu2  ;;  %530 = vst [vmem:[%s1014_s20] sm:$0xff] %v523_v31  ;;  %v546_v39 = vmul.f32 %v523_v31, %v523_v31 }
  0xb6   : > { %v479_v35 = vadd.f32 %v478_v33, %v449_v32 }
  0xb7   : > { %v525_v36 = vpop.f32.mrf.mxu3 }
  0xb8   : > { %529 = vst [vmem:[%s1011_s29 + $0x8] sm:$0xff] %v479_v35  ;;  %v537_v37 = vmul.f32 %v479_v35, %v479_v35  ;;  %v526_v38 = vadd.f32 %v525_v36, %v497_v34 }
  0xb9   : > { %v612_v55 = vld [vmem:[%s1011_s29] sm:$0xff] (%p957_p5) }
  0xba   : > { %540 = vadd.xlane.f32.xlu1 %v537_v37  ;;  %534 = vadd.xlane.f32.xlu2 %v479_v35  ;;  %531 = vst [vmem:[%s1014_s20 + $0x8] sm:$0xff] %v526_v38  ;;  %v547_v40 = vmul.f32 %v526_v38, %v526_v38 }
  0xbb   : > { %613 = vst [vmem:[%s581_s10] sm:$0xff] (%p957_p5), %v612_v55 }
  0xbf   : > { %v614_v56 = vld [vmem:[%s1011_s29 + $0x8] sm:$0xff] (%p957_p5) }
  0xc0   : > { %615 = vst [vmem:[%s581_s10 + $0x20] sm:$0xff] (%p957_p5), %v614_v56 }
  0xc2   : > { %542 = vadd.xlane.f32.xlu2 %v523_v31 }
  0xca   : > { %544 = vadd.xlane.f32.xlu2 %v526_v38 }
  0xd2   : > { %548 = vadd.xlane.f32.xlu2 %v546_v39 }
  0xda   : > { %550 = vadd.xlane.f32.xlu2 %v547_v40 }
 0x125   : > { %v533_v41 = vpop.xlane.xlu2 %532 }
 0x127   : > { %v539_v45 = vpop.xlane.xlu0 %538 }
 0x128   : > { %v553_v46 = vsel %vm552_vm1, %v533_v41, %v539_v45 }
 0x12d   : > { %v535_v42 = vpop.xlane.xlu2 %534  ;;  %v541_v50 = vpop.xlane.xlu1 %540 }
 0x12e   : > { %v554_v51 = vsel %vm552_vm1, %v535_v42, %v541_v50 }
 0x135   : > { %v543_v43 = vpop.xlane.xlu2 %542 }
 0x136   : > { %v556_v47 = vsel %vm555_vm2, %v553_v46, %v543_v43 }
 0x13d   : > { %v545_v44 = vpop.xlane.xlu2 %544 }
 0x13e   : > { %v557_v52 = vsel %vm555_vm2, %v554_v51, %v545_v44 }
 0x145   : > { %v549_v48 = vpop.xlane.xlu2 %548 }
 0x146   : > { %v559_v49 = vsel %vm558_vm3, %v556_v47, %v549_v48 }
 0x147   : > { %562 = vst.msk [vmem:[%s432_s23] sm:$0xff] %vm561_vm4, %v559_v49 }
 0x14b   : > { %579 = sbr.rel (!%p957_p5) target bundleno = 336 (0x150), region = 124 }
 0x14d   : > { %v551_v53 = vpop.xlane.xlu2 %550 }
 0x14e   : > { %v560_v54 = vsel %vm558_vm3, %v557_v52, %v551_v53 }
 0x14f   : > { %563 = vst.msk [vmem:[%s432_s23 + $0x8] sm:$0xff] %vm561_vm4, %v560_v54 }
 0x150 PF: > { %621 = sbr.rel (!%p957_p5) target bundleno = 341 (0x155), region = 162  ;;  %s813_s11 = sshll.u32 (%p957_p5), %s938_s30, 3  ;;  %v654_v57 = vld [vmem:[%s1014_s20] sm:$0xff] (%p957_p5)  ;;  %v656_v58 = vld [vmem:[%s1014_s20 + $0x8] sm:$0xff] (%p957_p5) }
 0x151   : > { %s623_s17 = scalar_lea.vmem (%p957_p5), %s1057_s7, %s813_s11 }
 0x152   : > { %655 = vst [vmem:[%s623_s17] sm:$0xff] (%p957_p5), %v654_v57 }
 0x153   : > { %657 = vst [vmem:[%s623_s17 + $0x20] sm:$0xff] (%p957_p5), %v656_v58 }
 0x155 PF: > { %p16_p11 = scmp.ge.s32.totalorder %s941_s9, 6   ;;  %s1061_s27 = smov %s870_s28 }
 0x156   : > { %s1062_s28 = smov %s951_s12  ;;  %s1063_s29 = smov %s941_s9 }
 0x157   :  { %18 = sbr.rel (!%p16_p11) target bundleno = 2 (0x2), region = 263 }

</bundles_post_ra>
